<compile_context>
chip_gen: v7x
topology: tpu7x:2x2x1
jax: 0.10.0
libtpu: 0.0.40
codegen_flags: <defaults>
</compile_context>

<pallas_src>
import functools
import math

import jax
import jax.numpy as jnp
from jax.experimental import pallas as pl
from jax.experimental.pallas import tpu as pltpu


def _coset_reduce(v, op, groups):
    """Reduce across the `groups` lane-groups of the last dim.

    v: (..., groups*h).  Every lane ends up holding the reduce over its coset
    {j, j+h, j+2h, ...} (mod groups*h), i.e. over all packed sequence
    sub-positions sharing the same hidden index.  Butterfly of log2(groups)
    roll+op steps (XLU slot, does not load the VALU).  `groups` must be a
    power of two (guaranteed by the wrapper).
    """
    if groups == 1:
        return v
    lanes = v.shape[-1]
    shift = lanes // groups
    r = v
    while shift < lanes:
        r = op(r, pltpu.roll(r, shift=shift, axis=v.ndim - 1))
        shift *= 2
    return r


def _self_attention_kernel(x_ref, w1t_ref, b1_ref, w2t_ref, b2_ref, o_ref, *, groups):
    bt, rows, lanes = x_ref.shape
    w_dtype = w1t_ref.dtype

    x_in = x_ref[...]                                      # (Bt, R, L), input dtype

    # Projection: Linear1 -> ReLU -> Linear2 as two (Bt*R, L) @ (L, L) MXU
    # matmuls (weights are block-diagonal copies of W^T when lane-packed).
    lhs = x_in.reshape(bt * rows, lanes).astype(w_dtype)
    h1 = jnp.dot(lhs, w1t_ref[...], preferred_element_type=jnp.float32)
    h1 = jnp.maximum(h1 + b1_ref[...], 0.0)                # ReLU, f32 on the VPU
    energy = jnp.dot(h1.astype(w_dtype), w2t_ref[...],
                     preferred_element_type=jnp.float32)
    energy = (energy + b2_ref[...]).reshape(bt, rows, lanes)

    # Softmax over the full sequence axis (PyTorch dim=1): reduce over the rows
    # axis, then across the packed lane-groups.  Numerically stable, f32.
    m = jnp.max(energy, axis=1, keepdims=True)             # (Bt, 1, L)
    m = _coset_reduce(m, jnp.maximum, groups)
    e = jnp.exp(energy - m)                                # (Bt, R, L)
    denom = jnp.sum(e, axis=1, keepdims=True)              # (Bt, 1, L)
    denom = _coset_reduce(denom, jnp.add, groups)
    # denom >= 1, so the ~2^-12-relative approx reciprocal is safe (EUP slot).
    inv = pl.reciprocal(denom, approx=True)

    # out = x * softmax(energy); reciprocal fused into the final multiply so
    # `weights` is never materialized as a separate slab.
    o_ref[...] = (x_in.astype(jnp.float32) * e * inv).astype(o_ref.dtype)


def _vmem_budget_bytes():
    """~70% of physical per-core VMEM (respects v7x's 64 MiB, uses v5e/v6e's 128 MiB)."""
    cap = 64 * 1024 * 1024  # conservative fallback = smallest (v7x per-TC)
    try:
        info = pltpu.get_tpu_info()
        cap_q = int(getattr(info, "vmem_capacity_bytes", 0) or 0)
        if cap_q > 0:
            cap = cap_q
    except Exception:
        pass
    return int(cap * 0.70)


def _pick_block_batch(batch, rows, lanes, in_bytes, out_bytes, vmem_budget):
    """Largest Bt such that (a) Bt | B, (b) grid >= min(B, 4) steps (>= 2 steps
    per v7x TensorCore so DMA overlaps compute), and (c) a padded-slab VMEM
    model (double-buffered in/out + ~5 slab-sized f32 temps + weights) fits."""
    row_pad = ((rows + 7) // 8) * 8
    lane_pad = ((lanes + 127) // 128) * 128
    # Two (L, L) weight blocks (assume double-buffered) + biases.
    fixed = 4 * lane_pad * lane_pad * 4 + 4 * 8 * lane_pad * 4

    def step_bytes(bt):
        slab = bt * row_pad * lane_pad
        return 2 * slab * in_bytes + 2 * slab * out_bytes + 5 * slab * 4 + fixed

    min_steps = min(batch, 4)
    best = 1
    for d in range(1, batch + 1):
        if batch % d:
            continue
        if batch // d < min_steps:
            break
        if step_bytes(d) <= vmem_budget:
            best = d
    return best


@functools.partial(jax.jit, static_argnames=("use_bf16_matmul",))
def self_attention(x, w1, b1, w2, b2, *, use_bf16_matmul=False):
    """ESIM SelfAttention forward.

    x: (B, S, H).  w1, w2: (H, H) in PyTorch nn.Linear layout (out, in).
    b1, b2: (H,).  Returns (B, S, H) with the same dtype as x (pass bf16 to
    halve HBM traffic; in-kernel math is f32 regardless).
    """
    B, S, H = x.shape
    mxu_dtype = jnp.bfloat16 if use_bf16_matmul else jnp.float32

    # Lane packing: fold `groups` consecutive sequence positions into the lane
    # dim (free, contiguous reshape) so stores / VPU math run lane-dense.
    groups = 1
    if H < 128 and 128 % H == 0:
        g = 128 // H
        while g > 1 and S % g != 0:
            g //= 2
        groups = g
    rows, lanes = S // groups, groups * H

    w1t = jnp.transpose(w1).astype(mxu_dtype)              # kernel does x @ W^T
    w2t = jnp.transpose(w2).astype(mxu_dtype)
    b1r = b1.astype(jnp.float32)
    b2r = b2.astype(jnp.float32)
    if groups > 1:
        eye = jnp.eye(groups, dtype=mxu_dtype)
        w1t = jnp.kron(eye, w1t)                           # block-diag (L, L)
        w2t = jnp.kron(eye, w2t)
        b1r = jnp.tile(b1r, groups)
        b2r = jnp.tile(b2r, groups)
    b1r = b1r.reshape(1, lanes)
    b2r = b2r.reshape(1, lanes)

    x_p = x.reshape(B, rows, lanes)                        # free reshape in HBM

    budget = _vmem_budget_bytes()
    bt = _pick_block_batch(B, rows, lanes,
                           x.dtype.itemsize, x.dtype.itemsize, budget)
    grid = (B // bt,)

    out_p = pl.pallas_call(
        functools.partial(_self_attention_kernel, groups=groups),
        out_shape=jax.ShapeDtypeStruct((B, rows, lanes), x.dtype),
        grid_spec=pltpu.PrefetchScalarGridSpec(
            num_scalar_prefetch=0,
            grid=grid,
            in_specs=[
                pl.BlockSpec((bt, rows, lanes), lambda b: (b, 0, 0)),  # x slab
                pl.BlockSpec((lanes, lanes), lambda b: (0, 0)),        # W1^T (constant)
                pl.BlockSpec((1, lanes), lambda b: (0, 0)),            # b1
                pl.BlockSpec((lanes, lanes), lambda b: (0, 0)),        # W2^T (constant)
                pl.BlockSpec((1, lanes), lambda b: (0, 0)),            # b2
            ],
            out_specs=pl.BlockSpec((bt, rows, lanes), lambda b: (b, 0, 0)),
        ),
        compiler_params=pltpu.CompilerParams(
            dimension_semantics=("parallel",),
            vmem_limit_bytes=budget,
        ),
    )(x_p, w1t, b1r, w2t, b2r)

    return out_p.reshape(B, S, H)


def _reference(x, w1, b1, w2, b2):
    h = jnp.maximum(jnp.einsum("bsh,oh->bso", x, w1) + b1, 0.0)
    energy = jnp.einsum("bsh,oh->bso", h, w2) + b2
    weights = jax.nn.softmax(energy, axis=1)
    return x * weights


def _make_params(key, h):
    kw1, kb1, kw2, kb2 = jax.random.split(key, 4)
    bound = 1.0 / math.sqrt(h)
    w1 = jax.random.uniform(kw1, (h, h), minval=-bound, maxval=bound, dtype=jnp.float32)
    b1 = jax.random.uniform(kb1, (h,), minval=-bound, maxval=bound, dtype=jnp.float32)
    w2 = jax.random.uniform(kw2, (h, h), minval=-bound, maxval=bound, dtype=jnp.float32)
    b2 = jax.random.uniform(kb2, (h,), minval=-bound, maxval=bound, dtype=jnp.float32)
    return w1, b1, w2, b2


if __name__ == "__main__":
    key = jax.random.PRNGKey(0)
    k1, k2, k3, k4 = jax.random.split(key, 4)

    # ---- Case 1: lane-packed path (H=32 -> 4 seq positions per 128 lanes). ----
    B, S, H = 8, 32, 32
    x = jax.random.normal(k1, (B, S, H), dtype=jnp.float32)
    w1, b1, w2, b2 = _make_params(k2, H)
    ref = _reference(x, w1, b1, w2, b2)

    out = jax.block_until_ready(self_attention(x, w1, b1, w2, b2))
    assert out.shape == (B, S, H)
    assert jnp.allclose(out, ref, atol=5e-3, rtol=5e-3), "f32 packed path mismatch"

    # bf16 at the pallas_call boundary (recommended: halves HBM traffic).
    x16 = x.astype(jnp.bfloat16)
    ref16 = _reference(x16.astype(jnp.float32), w1, b1, w2, b2)
    out16 = jax.block_until_ready(self_attention(x16, w1, b1, w2, b2))
    assert out16.shape == (B, S, H) and out16.dtype == jnp.bfloat16
    assert jnp.allclose(out16.astype(jnp.float32), ref16, atol=3e-2, rtol=3e-2), \
        "bf16-boundary packed path mismatch"

    # ---- Case 2: generic fallback (H does not divide 128 -> no packing). ----
    B2, S2, H2 = 4, 10, 48
    x2 = jax.random.normal(k3, (B2, S2, H2), dtype=jnp.float32)
    w1b, b1b, w2b, b2b = _make_params(k4, H2)
    ref2 = _reference(x2, w1b, b1b, w2b, b2b)
    out2 = jax.block_until_ready(self_attention(x2, w1b, b1b, w2b, b2b))
    assert out2.shape == (B2, S2, H2)
    assert jnp.allclose(out2, ref2, atol=5e-3, rtol=5e-3), "fallback path mismatch"

    print("KERNEL_OK")
</pallas_src>

<mosaic_0001>
module attributes {stable_mosaic.version = 11 : i64} {
  func.func @_self_attention_kernel(%arg0: i32, %arg1: memref<2x8x128xf32, #tpu.memory_space<vmem>>, %arg2: memref<128x128xf32, #tpu.memory_space<vmem>>, %arg3: memref<1x128xf32, #tpu.memory_space<vmem>>, %arg4: memref<128x128xf32, #tpu.memory_space<vmem>>, %arg5: memref<1x128xf32, #tpu.memory_space<vmem>>, %arg6: memref<2x8x128xf32, #tpu.memory_space<vmem>>) attributes {dimension_semantics = [#tpu.dimension_semantics<parallel>], iteration_bounds = array<i64: 4>, scalar_prefetch = 0 : i64, scratch_operands = 0 : i64, tpu.core_type = #tpu.core_type<tc>, window_params = [{transform_indices = @transform_0, window_bounds = array<i64: 2, 8, 128>}, {pipeline_mode = #tpu.pipeline_mode<synchronous>, transform_indices = @transform_1, window_bounds = array<i64: 128, 128>}, {pipeline_mode = #tpu.pipeline_mode<synchronous>, transform_indices = @transform_2, window_bounds = array<i64: 1, 128>}, {pipeline_mode = #tpu.pipeline_mode<synchronous>, transform_indices = @transform_3, window_bounds = array<i64: 128, 128>}, {pipeline_mode = #tpu.pipeline_mode<synchronous>, transform_indices = @transform_4, window_bounds = array<i64: 1, 128>}, {transform_indices = @transform_5, window_bounds = array<i64: 2, 8, 128>}]} {
    %c0 = arith.constant 0 : index
    %c0_0 = arith.constant 0 : index
    %c0_1 = arith.constant 0 : index
    %0 = vector.load %arg1[%c0, %c0_0, %c0_1] : memref<2x8x128xf32, #tpu.memory_space<vmem>>, vector<2x8x128xf32>
    %1 = vector.shape_cast %0 : vector<2x8x128xf32> to vector<16x128xf32>
    %c0_2 = arith.constant 0 : index
    %c0_3 = arith.constant 0 : index
    %2 = vector.load %arg2[%c0_2, %c0_3] : memref<128x128xf32, #tpu.memory_space<vmem>>, vector<128x128xf32>
    %cst = arith.constant dense<0.000000e+00> : vector<16x128xf32>
    %3 = tpu.matmul %1, %2, %cst {dimension_numbers = #tpu.dot_dimension_numbers<[1], [0], [0], [1], [0, 0, 1, 1], [], []>} : vector<16x128xf32>, vector<128x128xf32>, vector<16x128xf32> -> vector<16x128xf32>
    %c0_4 = arith.constant 0 : index
    %c0_5 = arith.constant 0 : index
    %4 = vector.load %arg3[%c0_4, %c0_5] : memref<1x128xf32, #tpu.memory_space<vmem>>, vector<1x128xf32>
    %5 = vector.broadcast %4 : vector<1x128xf32> to vector<16x128xf32>
    %6 = arith.addf %3, %5 : vector<16x128xf32>
    %cst_6 = arith.constant 0.000000e+00 : f32
    %7 = vector.broadcast %cst_6 : f32 to vector<16x128xf32>
    %8 = arith.maximumf %6, %7 : vector<16x128xf32>
    %c0_7 = arith.constant 0 : index
    %c0_8 = arith.constant 0 : index
    %9 = vector.load %arg4[%c0_7, %c0_8] : memref<128x128xf32, #tpu.memory_space<vmem>>, vector<128x128xf32>
    %cst_9 = arith.constant dense<0.000000e+00> : vector<16x128xf32>
    %10 = tpu.matmul %8, %9, %cst_9 {dimension_numbers = #tpu.dot_dimension_numbers<[1], [0], [0], [1], [0, 0, 1, 1], [], []>} : vector<16x128xf32>, vector<128x128xf32>, vector<16x128xf32> -> vector<16x128xf32>
    %c0_10 = arith.constant 0 : index
    %c0_11 = arith.constant 0 : index
    %11 = vector.load %arg5[%c0_10, %c0_11] : memref<1x128xf32, #tpu.memory_space<vmem>>, vector<1x128xf32>
    %12 = vector.broadcast %11 : vector<1x128xf32> to vector<16x128xf32>
    %13 = arith.addf %10, %12 : vector<16x128xf32>
    %14 = vector.shape_cast %13 : vector<16x128xf32> to vector<2x8x128xf32>
    %cst_12 = arith.constant dense<0xFF800000> : vector<2x128xf32>
    %15 = vector.multi_reduction <maximumf>, %14, %cst_12 [1] : vector<2x8x128xf32> to vector<2x128xf32>
    %16 = vector.shape_cast %15 : vector<2x128xf32> to vector<2x1x128xf32>
    %c32_i32 = arith.constant 32 : i32
    %17 = tpu.dynamic_rotate %16 by %c32_i32 dim 2 : vector<2x1x128xf32>, i32 -> vector<2x1x128xf32>
    %18 = arith.maximumf %16, %17 : vector<2x1x128xf32>
    %c64_i32 = arith.constant 64 : i32
    %19 = tpu.dynamic_rotate %18 by %c64_i32 dim 2 : vector<2x1x128xf32>, i32 -> vector<2x1x128xf32>
    %20 = arith.maximumf %18, %19 : vector<2x1x128xf32>
    %21 = vector.broadcast %20 : vector<2x1x128xf32> to vector<2x8x128xf32>
    %22 = arith.subf %14, %21 : vector<2x8x128xf32>
    %23 = math.exp %22 : vector<2x8x128xf32>
    %cst_13 = arith.constant dense<0.000000e+00> : vector<2x128xf32>
    %24 = vector.multi_reduction <add>, %23, %cst_13 [1] : vector<2x8x128xf32> to vector<2x128xf32>
    %25 = vector.shape_cast %24 : vector<2x128xf32> to vector<2x1x128xf32>
    %c32_i32_14 = arith.constant 32 : i32
    %26 = tpu.dynamic_rotate %25 by %c32_i32_14 dim 2 : vector<2x1x128xf32>, i32 -> vector<2x1x128xf32>
    %27 = arith.addf %25, %26 : vector<2x1x128xf32>
    %c64_i32_15 = arith.constant 64 : i32
    %28 = tpu.dynamic_rotate %27 by %c64_i32_15 dim 2 : vector<2x1x128xf32>, i32 -> vector<2x1x128xf32>
    %29 = arith.addf %27, %28 : vector<2x1x128xf32>
    %30 = tpu.reciprocal %29 {approx = true} : vector<2x1x128xf32> -> vector<2x1x128xf32>
    %31 = arith.mulf %0, %23 : vector<2x8x128xf32>
    %32 = vector.broadcast %30 : vector<2x1x128xf32> to vector<2x8x128xf32>
    %33 = arith.mulf %31, %32 : vector<2x8x128xf32>
    %c0_16 = arith.constant 0 : index
    %c0_17 = arith.constant 0 : index
    %c0_18 = arith.constant 0 : index
    %34 = vector.load %arg6[%c0_16, %c0_17, %c0_18] : memref<2x8x128xf32, #tpu.memory_space<vmem>>, vector<2x8x128xf32>
    tpu.vector_store %arg6[%c0_16, %c0_17, %c0_18], %33 {strides = array<i32>} : memref<2x8x128xf32, #tpu.memory_space<vmem>>, vector<2x8x128xf32>,
    return
  }
  func.func @transform_0(%arg0: i32) -> (i32, i32, i32) {
    %c0_i32 = arith.constant 0 : i32
    %c0_i32_0 = arith.constant 0 : i32
    %c0_i32_1 = arith.constant 0 : i32
    return %arg0, %c0_i32, %c0_i32_0 : i32, i32, i32
  }
  func.func @transform_1(%arg0: i32) -> (i32, i32) {
    %c0_i32 = arith.constant 0 : i32
    %c0_i32_0 = arith.constant 0 : i32
    %c0_i32_1 = arith.constant 0 : i32
    return %c0_i32, %c0_i32_0 : i32, i32
  }
  func.func @transform_2(%arg0: i32) -> (i32, i32) {
    %c0_i32 = arith.constant 0 : i32
    %c0_i32_0 = arith.constant 0 : i32
    %c0_i32_1 = arith.constant 0 : i32
    return %c0_i32, %c0_i32_0 : i32, i32
  }
  func.func @transform_3(%arg0: i32) -> (i32, i32) {
    %c0_i32 = arith.constant 0 : i32
    %c0_i32_0 = arith.constant 0 : i32
    %c0_i32_1 = arith.constant 0 : i32
    return %c0_i32, %c0_i32_0 : i32, i32
  }
  func.func @transform_4(%arg0: i32) -> (i32, i32) {
    %c0_i32 = arith.constant 0 : i32
    %c0_i32_0 = arith.constant 0 : i32
    %c0_i32_1 = arith.constant 0 : i32
    return %c0_i32, %c0_i32_0 : i32, i32
  }
  func.func @transform_5(%arg0: i32) -> (i32, i32, i32) {
    %c0_i32 = arith.constant 0 : i32
    %c0_i32_0 = arith.constant 0 : i32
    %c0_i32_1 = arith.constant 0 : i32
    return %arg0, %c0_i32, %c0_i32_0 : i32, i32, i32
  }
}

</mosaic_0001>

<bundles_post_ra>
// kernel: tile.13
= control target key start
LH: loop header
LB: loop body
LE: loop exit
PB: predicated region body
PF: predicated region fallthrough
CT: control target
= control target key end

     0   :  { %s22_s0 = inlined_call_operand.vmem [shape: f32[32], index: 0, kind: input, shape index: {}]   ;;  %s23_s1 = inlined_call_operand.vmem [shape: f32[4,32], index: 1, kind: output, shape index: {}]  }
   0x1   :  { %v4_v0 = vld [vmem:[%s22_s0] ss:$0 sm:$0xff] }
   0x2   :  { %5 = vst [vmem:[%s23_s1] sm:$0xf] %v4_v0 }

// kernel: tile.18
= control target key start
LH: loop header
LB: loop body
LE: loop exit
PB: predicated region body
PF: predicated region fallthrough
CT: control target
= control target key end

     0   :  { %vm7_vm0 = vcmask 261120   ;;  %s37_s8 = smov 32   ;;  %s38_s9 = smov 64   ;;  %vm13_vm1 = vcmask 1048320   ;;  %vm19_vm2 = vcmask 785920   ;;  %vm25_vm3 = vcmask 523520   ;;  %s55_s0 = inlined_call_operand.vmem [shape: f32[4,32], index: 0, kind: input, shape index: {}]   ;;  %s56_s1 = inlined_call_operand.vmem [shape: f32[1,128], index: 1, kind: output, shape index: {}]  }
   0x1   :  { %v4_v0 = vld [vmem:[%s55_s0] sm:$0xf]  ;;  %s36_s0 = smov 96  }
   0x2   :  { %5 = vst [vmem:[#allocation1] sm:$0xf] %v4_v0 }
   0x9   :  { %v10_v1 = vld [vmem:[#allocation1 + $0x3] sm:$0x1]   ;;  %v22_v2 = vld [vmem:[#allocation1 + $0x1] sm:$0x1]   ;;  %v6_v3 = vld [vmem:[#allocation1] sm:$0x1]  }
   0xa   :  { %11 = vrot.lane.b32.xlu0 %v10_v1, %s36_s0  ;;  %23 = vrot.lane.b32.xlu1 %v22_v2, %s37_s8  ;;  %v16_v4 = vld [vmem:[#allocation1 + $0x2] sm:$0x1]   ;;  %8 = vst.msk [vmem:[#allocation0] sm:$0x1] %vm7_vm0, %v6_v3  }
   0xe   :  { %17 = vrot.lane.b32.xlu0 %v16_v4, %s38_s9 }
  0x7c   :  { %v12_v5 = vpop.permute.xlu0 %11   ;;  %v24_v6 = vpop.permute.xlu1 %23  }
  0x7d   :  { %14 = vst.msk [vmem:[#allocation0] sm:$0x1] %vm13_vm1, %v12_v5  }
  0x80   :  { %v18_v7 = vpop.permute.xlu0 %17  }
  0x81   :  { %20 = vst.msk [vmem:[#allocation0] sm:$0x1] %vm19_vm2, %v18_v7  }
  0x82   :  { %26 = vst.msk [vmem:[#allocation0] sm:$0x1] %vm25_vm3, %v24_v6  }
  0x89   :  { %v30_v8 = vld [vmem:[#allocation0] sm:$0x1] }
  0x8a   :  { %32 = vst [vmem:[%s56_s1] sm:$0x1] %v30_v8 }

// kernel: self_attention.1
= control target key start
LH: loop header
LB: loop body
LE: loop exit
PB: predicated region body
PF: predicated region fallthrough
CT: control target
= control target key end

     0   :  { %s803_s18 = smov 0   ;;  %s949_s0 = inlined_call_operand.vmem [shape: f32[8,8,128], index: 0, kind: input, shape index: {}]   ;;  %s950_s1 = inlined_call_operand.vmem [shape: f32[128,128], index: 1, kind: input, shape index: {}]   ;;  %s951_s2 = inlined_call_operand.vmem [shape: f32[1,128], index: 2, kind: input, shape index: {}]   ;;  %s952_s3 = inlined_call_operand.vmem [shape: f32[128,128], index: 3, kind: input, shape index: {}]   ;;  %s953_s4 = inlined_call_operand.vmem [shape: f32[1,128], index: 4, kind: input, shape index: {}]   ;;  %s954_s5 = inlined_call_operand.vmem [shape: f32[8,8,128], index: 5, kind: output, shape index: {}]  }
   0x1 LB: > { %s562_s19 = sadd.s32 4294967295, %s769_s18   ;;  %p566_p0 = scmp.ge.s32.totalorder %s769_s18, 1  ;;  %s769_s18 = sphi %s803_s18, %s15_s18  }
   0x2   : > { %p188_p1 = scmp.lt.s32.totalorder %s769_s18, 5 }
   0x4   : > { %p189_p2 = pnand %p566_p0, %p188_p1 }
   0x5   : > { %v230_v0 = vld [vmem:[%s950_s1] sm:$0xff] (!%p189_p2)  ;;  %v231_v1 = vld [vmem:[%s950_s1 + $0x8] sm:$0xff] (!%p189_p2)  ;;  %v232_v2 = vld [vmem:[%s950_s1 + $0x10] sm:$0xff] (!%p189_p2)  ;;  %s567_s26 = sshll.u32 (!%p189_p2), %s562_s19, 1  ;;  %s771_s27 = smov (!%p189_p2), 32  }
   0x6   : > { %192 = sbr.rel (%p189_p2) target bundleno = 1002 (0x3ea), region = 40  ;;  %v681_v3 = vpack.c.bf16 (!%p189_p2), %v231_v1, %v230_v0  ;;  %v233_v4 = vld [vmem:[%s950_s1 + $0x18] sm:$0xff] (!%p189_p2)  ;;  %p217_p3 = scmp.lt.s32.totalorder (!%p189_p2), %s567_s26, 7  ;;  %v234_v6 = vld [vmem:[%s950_s1 + $0x20] sm:$0xff] (!%p189_p2)  ;;  %v235_v7 = vld [vmem:[%s950_s1 + $0x28] sm:$0xff] (!%p189_p2) }
   0x7   : > { %v685_v5 = vpack.c.bf16 (!%p189_p2), %v233_v4, %v232_v2  ;;  %v689_v8 = vpack.c.bf16 (!%p189_p2), %v235_v7, %v234_v6  ;;  %v236_v9 = vld [vmem:[%s950_s1 + $0x30] sm:$0xff] (!%p189_p2)  ;;  %v330_v10 = vld [vmem:[%s952_s3] sm:$0xff] (!%p189_p2)  ;;  %v331_v11 = vld [vmem:[%s952_s3 + $0x8] sm:$0xff] (!%p189_p2)  ;;  %s772_s28 = smov (!%p189_p2), 64  }
   0x8   : > { %682 = vmatprep.subr.bf16.mxu0 (!%p189_p2), %v681_v3  ;;  %v237_v12 = vld [vmem:[%s950_s1 + $0x38] sm:$0xff] (!%p189_p2)  ;;  %v713_v13 = vpack.c.bf16 (!%p189_p2), %v331_v11, %v330_v10  ;;  %v332_v14 = vld [vmem:[%s952_s3 + $0x10] sm:$0xff] (!%p189_p2)  ;;  %v334_v18 = vld [vmem:[%s952_s3 + $0x20] sm:$0xff] (!%p189_p2) }
   0x9   : > { %684 = vmatpush3.bf16.msra.mxu0 (!%p189_p2), %v681_v3  ;;  %v333_v15 = vld [vmem:[%s952_s3 + $0x18] sm:$0xff] (!%p189_p2)  ;;  %v335_v19 = vld [vmem:[%s952_s3 + $0x28] sm:$0xff] (!%p189_p2)  ;;  %v693_v20 = vpack.c.bf16 (!%p189_p2), %v237_v12, %v236_v9  ;;  %v238_v21 = vld [vmem:[%s950_s1 + $0x40] sm:$0xff] (!%p189_p2) }
   0xa   : > { %686 = vmatprep.subr.bf16.mxu0 (!%p189_p2), %v685_v5  ;;  %v717_v17 = vpack.c.bf16 (!%p189_p2), %v333_v15, %v332_v14  ;;  %714 = vmatprep.subr.bf16.mxu1 (!%p189_p2), %v713_v13  ;;  %v239_v22 = vld [vmem:[%s950_s1 + $0x48] sm:$0xff] (!%p189_p2)  ;;  %v721_v23 = vpack.c.bf16 (!%p189_p2), %v335_v19, %v334_v18  ;;  %v336_v24 = vld [vmem:[%s952_s3 + $0x30] sm:$0xff] (!%p189_p2)  ;;  %v337_v25 = vld [vmem:[%s952_s3 + $0x38] sm:$0xff] (!%p189_p2)  ;;  %v452_v14 = vlaneseq (!%p189_p2) }
   0xb   : > { %716 = vmatpush3.bf16.msra.mxu1 (!%p189_p2), %v713_v13  ;;  %v697_v26 = vpack.c.bf16 (!%p189_p2), %v239_v22, %v238_v21  ;;  %v240_v27 = vld [vmem:[%s950_s1 + $0x50] sm:$0xff] (!%p189_p2)  ;;  %v241_v28 = vld [vmem:[%s950_s1 + $0x58] sm:$0xff] (!%p189_p2)  ;;  %v725_v29 = vpack.c.bf16 (!%p189_p2), %v337_v25, %v336_v24  ;;  %v338_v30 = vld [vmem:[%s952_s3 + $0x40] sm:$0xff] (!%p189_p2) }
   0xc   : > { %718 = vmatprep.subr.bf16.mxu1 (!%p189_p2), %v717_v17  ;;  %v339_v31 = vld [vmem:[%s952_s3 + $0x48] sm:$0xff] (!%p189_p2)  ;;  %v701_v32 = vpack.c.bf16 (!%p189_p2), %v241_v28, %v240_v27  ;;  %v242_v33 = vld [vmem:[%s950_s1 + $0x60] sm:$0xff] (!%p189_p2)  ;;  %v340_v36 = vld [vmem:[%s952_s3 + $0x50] sm:$0xff] (!%p189_p2)  ;;  %v453_v15 = vshrl.u32 (!%p189_p2), %v452_v14, 7 }
   0xd   : > { %s956_s26 = smov (!%p217_p3, %s567_s26), 7  ;;  %688 = vmatpush3.bf16.msra.mxu0 %v685_v5  ;;  %v243_v34 = vld [vmem:[%s950_s1 + $0x68] sm:$0xff]  ;;  %v729_v35 = vpack.c.bf16 %v339_v31, %v338_v30  ;;  %v341_v37 = vld [vmem:[%s952_s3 + $0x58] sm:$0xff]  ;;  %v244_v39 = vld [vmem:[%s950_s1 + $0x70] sm:$0xff] }
   0xe   : > { %s568_s10 = sshll.u32 %s956_s26, 3  ;;  %690 = vmatprep.subr.bf16.mxu0 %v689_v8  ;;  %v705_v38 = vpack.c.bf16 %v243_v34, %v242_v33  ;;  %v245_v40 = vld [vmem:[%s950_s1 + $0x78] sm:$0xff]  ;;  %v733_v41 = vpack.c.bf16 %v341_v37, %v340_v36  ;;  %v342_v42 = vld [vmem:[%s952_s3 + $0x60] sm:$0xff]  ;;  %v343_v43 = vld [vmem:[%s952_s3 + $0x68] sm:$0xff] }
   0xf   : > { %s849_s20 = scalar_lea.vmem %s949_s0, %s568_s10  ;;  %720 = vmatpush3.bf16.msra.mxu1 %v717_v17  ;;  %v709_v44 = vpack.c.bf16 %v245_v40, %v244_v39  ;;  %v737_v45 = vpack.c.bf16 %v343_v43, %v342_v42  ;;  %v344_v47 = vld [vmem:[%s952_s3 + $0x70] sm:$0xff]  ;;  %v345_v48 = vld [vmem:[%s952_s3 + $0x78] sm:$0xff]  ;;  %v571_v50 = vld [vmem:[%s951_s2] ss:$0 sm:$0xff]  ;;  %v454_v17 = vsub.s32 0, %v453_v15  ;;  %s226_s6 = scalar_lea.vmem %s954_s5, %s568_s10 }
  0x10   : > { %v858_v16 = vld [vmem:[%s849_s20] sm:$0xff]  ;;  %722 = vmatprep.subr.bf16.mxu1 %v721_v23  ;;  %v916_v46 = vld [vmem:[%s849_s20 + $0x8] sm:$0xff]  ;;  %v741_v49 = vpack.c.bf16 %v345_v48, %v344_v47 }
  0x11   : > { %643 = vmatprep.mubr.f32.mxu0 %v858_v16  ;;  %692 = vmatpush3.bf16.msra.mxu0 %v689_v8  ;;  %v572_v57 = vld [vmem:[%s953_s4] ss:$0 sm:$0xff] }
  0x12   : > { %694 = vmatprep.subr.bf16.mxu0 %v693_v20 }
  0x13   : > { %724 = vmatpush3.bf16.msra.mxu1 %v721_v23 }
  0x14   : > { %726 = vmatprep.subr.bf16.mxu1 %v725_v29 }
  0x15   : > { %696 = vmatpush3.bf16.msra.mxu0 %v693_v20 }
  0x16   : > { %698 = vmatprep.subr.bf16.mxu0 %v697_v26 }
  0x17   : > { %728 = vmatpush3.bf16.msra.mxu1 %v725_v29 }
  0x18   : > { %730 = vmatprep.subr.bf16.mxu1 %v729_v35 }
  0x19   : > { %700 = vmatpush3.bf16.msra.mxu0 %v697_v26 }
  0x1a   : > { %702 = vmatprep.subr.bf16.mxu0 %v701_v32 }
  0x1b   : > { %732 = vmatpush3.bf16.msra.mxu1 %v729_v35 }
  0x1c   : > { %734 = vmatprep.subr.bf16.mxu1 %v733_v41 }
  0x1d   : > { %704 = vmatpush3.bf16.msra.mxu0 %v701_v32 }
  0x1e   : > { %706 = vmatprep.subr.bf16.mxu0 %v705_v38 }
  0x1f   : > { %736 = vmatpush3.bf16.msra.mxu1 %v733_v41 }
  0x20   : > { %738 = vmatprep.subr.bf16.mxu1 %v737_v45 }
  0x21   : > { %708 = vmatpush3.bf16.msra.mxu0 %v705_v38 }
  0x22   : > { %710 = vmatprep.subr.bf16.mxu0 %v709_v44 }
  0x23   : > { %740 = vmatpush3.bf16.msra.mxu1 %v737_v45 }
  0x24   : > { %742 = vmatprep.subr.bf16.mxu1 %v741_v49 }
  0x25   : > { %712 = vmatpush3.bf16.msra.mxu0 %v709_v44 }
  0x27   : > { %744 = vmatpush3.bf16.msra.mxu1 %v741_v49 }
  0x28   : > { %644 = vmatmul.mubr.f32.vlgmr.msra.gmra.mrb[0].mxu0 %v916_v46 }
  0xfb   : > { %v645_v51 = vpop.f32.mrb[0].mxu0 }
  0xfc   : > { %v325_v52 = vadd.f32 %v645_v51, %v571_v50  ;;  %v319_v53 = vpop.f32.mrb[1].mxu0 }
  0xfd   : > { %v320_v54 = vadd.f32 %v571_v50, %v319_v53 }
  0xfe   : > { %v329_v56 = vmax.f32 %v325_v52, 0.0 }
  0xff   : > { %v328_v55 = vmax.f32 %v320_v54, 0.0 }
 0x101   : > { %678 = vmatprep.mubr.f32.mxu1 %v328_v55 }
 0x102   : > { %679 = vmatmul.mubr.f32.vlgmr.msra.gmra.mrb[0].mxu1 %v329_v56 }
 0x1d5   : > { %v680_v58 = vpop.f32.mrb[0].mxu1 }
 0x1d6   : > { %v425_v59 = vadd.f32 %v680_v58, %v572_v57  ;;  %v419_v60 = vpop.f32.mrb[1].mxu1 }
 0x1d7   : > { %v420_v61 = vadd.f32 %v572_v57, %v419_v60 }
 0x1d8   : > { %v434_v62 = vrot.slane %v425_v59, 4 }
 0x1d9   : > { %v428_v63 = vrot.slane %v420_v61, 4 }
 0x1da   : > { %v435_v0 = vmax.f32 %v425_v59, %v434_v62 }
 0x1db   : > { %v429_v1 = vmax.f32 %v420_v61, %v428_v63 }
 0x1dc   : > { %v436_v2 = vrot.slane %v435_v0, 2 }
 0x1dd   : > { %v430_v3 = vrot.slane %v429_v1, 2 }
 0x1de   : > { %v437_v5 = vmax.f32 %v435_v0, %v436_v2 }
 0x1df   : > { %v431_v4 = vmax.f32 %v429_v1, %v430_v3 }
 0x1e0   : > { %v438_v8 = vrot.slane %v437_v5, 1 }
 0x1e1   : > { %v432_v6 = vrot.slane %v431_v4, 1 }
 0x1e2   : > { %v439_v9 = vmax.f32 %v437_v5, %v438_v8 }
 0x1e3   : > { %v433_v7 = vmax.f32 %v431_v4, %v432_v6 }
 0x1e5   : > { %440 = vrot.lane.b32.xlu0 %v433_v7, %s771_s27 }
 0x1e9   : > { %442 = vrot.lane.b32.xlu0 %v439_v9, %s771_s27 }
 0x257   : > { %v441_v10 = vpop.permute.xlu0 %440 }
 0x258   : > { %v444_v11 = vmax.f32 %v433_v7, %v441_v10 }
 0x25a   : > { %446 = vrot.lane.b32.xlu1 %v444_v11, %s772_s28 }
 0x25b   : > { %v443_v12 = vpop.permute.xlu0 %442 }
 0x25c   : > { %v445_v13 = vmax.f32 %v439_v9, %v443_v12 }
 0x25e   : > { %448 = vrot.lane.b32.xlu1 %v445_v13, %s772_s28 }
 0x2cc   : > { %v447_v18 = vpop.permute.xlu1 %446 }
 0x2cd   : > { %v450_v19 = vmax.f32 %v444_v11, %v447_v18 }
 0x2cf   : > { %v455_v20 = vrot.slane %v450_v19, %v454_v17 }
 0x2d0   : > { %v449_v21 = vpop.permute.xlu1 %448 }
 0x2d1   : > { %v460_v22 = vsub.f32 %v420_v61, %v455_v20  ;;  %v451_v23 = vmax.f32 %v445_v13, %v449_v21 }
 0x2d3   : > { %v462_v24 = vmul.f32 1.442695, %v460_v22  ;;  %v459_v25 = vrot.slane %v451_v23, %v454_v17 }
 0x2d5   : > { %755 = vpow2.f32 %v462_v24  ;;  %v461_v26 = vsub.f32 %v425_v59, %v459_v25 }
 0x2d7   : > { %v464_v27 = vmul.f32 1.442695, %v461_v26 }
 0x2d9   : > { %757 = vpow2.f32 %v464_v27 }
 0x2df   : > { %v756_v28 = vpop.eup %755 }
 0x2e0   : > { %v466_v29 = vrot.slane %v756_v28, 4  ;;  %v492_v52 = vmul.f32 %v756_v28, %v858_v16 }
 0x2e2   : > { %v467_v30 = vadd.f32 %v756_v28, %v466_v29 }
 0x2e3   : > { %v758_v31 = vpop.eup %757 }
 0x2e4   : > { %v468_v32 = vrot.slane %v467_v30, 2  ;;  %v472_v33 = vrot.slane %v758_v31, 4  ;;  %v493_v56 = vmul.f32 %v758_v31, %v916_v46 }
 0x2e6   : > { %v469_v34 = vadd.f32 %v468_v32, %v467_v30  ;;  %v473_v35 = vadd.f32 %v758_v31, %v472_v33 }
 0x2e8   : > { %v470_v36 = vrot.slane %v469_v34, 1  ;;  %v474_v37 = vrot.slane %v473_v35, 2 }
 0x2ea   : > { %v471_v38 = vadd.f32 %v470_v36, %v469_v34  ;;  %v475_v39 = vadd.f32 %v474_v37, %v473_v35 }
 0x2ec   : > { %478 = vrot.lane.b32.xlu0 %v471_v38, %s771_s27  ;;  %v476_v40 = vrot.slane %v475_v39, 1 }
 0x2ee   : > { %v477_v41 = vadd.f32 %v476_v40, %v475_v39 }
 0x2f0   : > { %480 = vrot.lane.b32.xlu1 %v477_v41, %s771_s27 }
 0x35e   : > { %v479_v42 = vpop.permute.xlu0 %478 }
 0x35f   : > { %v482_v43 = vadd.f32 %v479_v42, %v471_v38 }
 0x361   : > { %484 = vrot.lane.b32.xlu0 %v482_v43, %s772_s28 }
 0x362   : > { %v481_v44 = vpop.permute.xlu1 %480 }
 0x363   : > { %v483_v45 = vadd.f32 %v481_v44, %v477_v41 }
 0x365   : > { %486 = vrot.lane.b32.xlu1 %v483_v45, %s772_s28 }
 0x3d3   : > { %v485_v47 = vpop.permute.xlu0 %484 }
 0x3d4   : > { %v488_v48 = vadd.f32 %v485_v47, %v482_v43 }
 0x3d6   : > { %759 = vrcp.f32 %v488_v48 }
 0x3d7   : > { %v487_v49 = vpop.permute.xlu1 %486 }
 0x3d8   : > { %v489_v50 = vadd.f32 %v487_v49, %v483_v45 }
 0x3da   : > { %761 = vrcp.f32 %v489_v50 }
 0x3e0   : > { %v760_v51 = vpop.eup %759 }
 0x3e1   : > { %v497_v53 = vrot.slane %v760_v51, %v454_v17 }
 0x3e3   : > { %v502_v54 = vmul.f32 %v497_v53, %v492_v52 }
 0x3e4   : > { %v762_v55 = vpop.eup %761 }
 0x3e5   : > { %504 = vst [vmem:[%s226_s6] sm:$0xff] %v502_v54  ;;  %v501_v57 = vrot.slane %v762_v55, %v454_v17 }
 0x3e7   : > { %v503_v58 = vmul.f32 %v501_v57, %v493_v56 }
 0x3e9   : > { %505 = vst [vmem:[%s226_s6 + $0x8] sm:$0xff] %v503_v58 }
 0x3ea PF: > { %s15_s18 = sadd.s32 1, %s769_s18  }
 0x3eb   : > { %p12_p4 = scmp.ge.s32.totalorder %s15_s18, 6  }
 0x3ed   :  { %14 = sbr.rel (!%p12_p4) target bundleno = 1 (0x1), region = 70 }

</bundles_post_ra>
